<compile_context>
chip_gen: v7x
topology: tpu7x:2x2x1
jax: 0.10.0
libtpu: 0.0.40
codegen_flags: <defaults>
</compile_context>

<pallas_src>
import jax
import jax.numpy as jnp
from jax.experimental import pallas as pl
from jax.experimental.pallas import tpu as pltpu

BN_EPS = 1e-5
_LANE = 128


def _round_up(v, m):
    return ((v + m - 1) // m) * m


def _make_kernel(n_valid, tile_n):
    """Build the 3-phase kernel, closing over the true batch size and tile."""
    inv_n = 1.0 / float(n_valid)

    def bn_relu(z, mean_col, var_col, gamma, beta):
        zn = (z - mean_col) * jax.lax.rsqrt(var_col + BN_EPS)
        return jnp.maximum(gamma * zn + beta, 0.0)

    def kernel(xt_ref, w1_ref, w23_ref, w4_ref, vecs_ref, o_ref, stats_ref):
        phase = pl.program_id(0)   # 0: z2 stats, 1: z3 stats, 2: output
        t = pl.program_id(1)       # batch tile index

        @pl.when((phase == 0) & (t == 0))
        def _init():
            stats_ref[...] = jnp.zeros_like(stats_ref)

        # ---- parameters: constant index maps -> DMA'd once, VMEM-resident ----
        w1 = w1_ref[...]           # (32, 6)   PyTorch (out, in) layout
        w2 = w23_ref[0]            # (32, 32)
        w3 = w23_ref[1]            # (32, 32)
        w4 = w4_ref[...]           # (4, 32)
        b1 = vecs_ref[:, 0:1]
        b2 = vecs_ref[:, 1:2]
        g2 = vecs_ref[:, 2:3]
        be2 = vecs_ref[:, 3:4]
        b3 = vecs_ref[:, 4:5]
        g3 = vecs_ref[:, 5:6]
        be3 = vecs_ref[:, 6:7]
        b4 = vecs_ref[0:4, 7:8]    # (4, 1)

        # validity mask for padded batch columns (batch lives on the lane axis)
        col = t * tile_n + jax.lax.broadcasted_iota(jnp.int32, (32, tile_n), 1)
        valid = col < n_valid

        # layers 1-2 up to the pre-BN activation (recomputed every phase;
        # the flops are negligible next to streaming x from HBM)
        xt = xt_ref[...]                                                    # (6, T)
        h1 = jnp.maximum(
            jnp.dot(w1, xt, preferred_element_type=jnp.float32) + b1, 0.0)  # (32, T)
        z2 = jnp.dot(w2, h1, preferred_element_type=jnp.float32) + b2       # (32, T)

        @pl.when(phase == 0)
        def _accum_layer2_stats():
            zm = jnp.where(valid, z2, 0.0)
            stats_ref[:, 0:1] += jnp.sum(zm, axis=1, keepdims=True)
            stats_ref[:, 1:2] += jnp.sum(zm * zm, axis=1, keepdims=True)

        @pl.when(phase == 1)
        def _accum_layer3_stats():
            mean2 = stats_ref[:, 0:1] * inv_n
            var2 = stats_ref[:, 1:2] * inv_n - mean2 * mean2
            h2 = bn_relu(z2, mean2, var2, g2, be2)
            z3 = jnp.dot(w3, h2, preferred_element_type=jnp.float32) + b3
            zm = jnp.where(valid, z3, 0.0)
            stats_ref[:, 2:3] += jnp.sum(zm, axis=1, keepdims=True)
            stats_ref[:, 3:4] += jnp.sum(zm * zm, axis=1, keepdims=True)

        @pl.when(phase == 2)
        def _finalize():
            mean2 = stats_ref[:, 0:1] * inv_n
            var2 = stats_ref[:, 1:2] * inv_n - mean2 * mean2
            h2 = bn_relu(z2, mean2, var2, g2, be2)
            z3 = jnp.dot(w3, h2, preferred_element_type=jnp.float32) + b3
            mean3 = stats_ref[:, 2:3] * inv_n
            var3 = stats_ref[:, 3:4] * inv_n - mean3 * mean3
            h3 = bn_relu(z3, mean3, var3, g3, be3)
            z4 = jnp.dot(w4, h3, preferred_element_type=jnp.float32) + b4   # (4, T)
            # sigmoid: exp on the EUP, exact reciprocal for the tiny divide
            o_ref[...] = pl.reciprocal(1.0 + jnp.exp(-z4), approx=False)

    return kernel


def fully_connected_forward(x, params, *, tile_n=512):
    """x: (N, 6) f32.  params: PyTorch-layout weights/biases.  Returns (N, 4)."""
    (w1, b1, w2, b2, g2, be2, w3, b3, g3, be3, w4, b4) = params
    n = x.shape[0]
    assert x.shape[1] == 6

    # lane-aligned batch tile; keep small tests tight, big batches at 512 lanes
    tile = _round_up(min(tile_n, _round_up(n, _LANE)), _LANE)
    n_pad = _round_up(n, tile)
    num_tiles = n_pad // tile

    # transposed, padded input: batch on the lane axis
    xt = jnp.pad(x.astype(jnp.float32), ((0, n_pad - n), (0, 0))).T      # (6, n_pad)

    # pack parameters: 4 DMAs instead of 13
    w23 = jnp.stack([w2, w3]).astype(jnp.float32)                        # (2, 32, 32)
    b4p = jnp.pad(b4.astype(jnp.float32), (0, 32 - b4.shape[0]))
    vecs = jnp.stack([b1, b2, g2, be2, b3, g3, be3, b4p], axis=1).astype(jnp.float32)  # (32, 8)

    kernel = _make_kernel(n, tile)

    out_t = pl.pallas_call(
        kernel,
        out_shape=jax.ShapeDtypeStruct((4, n_pad), jnp.float32),
        grid_spec=pltpu.PrefetchScalarGridSpec(
            num_scalar_prefetch=0,
            grid=(3, num_tiles),                      # (phase, batch tile)
            in_specs=[
                pl.BlockSpec((6, tile), lambda p, t: (0, t)),        # x^T stream
                pl.BlockSpec((32, 6), lambda p, t: (0, 0)),          # W1 (resident)
                pl.BlockSpec((2, 32, 32), lambda p, t: (0, 0, 0)),   # W2/W3 (resident)
                pl.BlockSpec((4, 32), lambda p, t: (0, 0)),          # W4 (resident)
                pl.BlockSpec((32, 8), lambda p, t: (0, 0)),          # biases/BN params
            ],
            out_specs=pl.BlockSpec((4, tile), lambda p, t: (0, t)),  # lane-dense store
            scratch_shapes=[pltpu.VMEM((32, 4), jnp.float32)],       # BN sum / sumsq
        ),
        compiler_params=pltpu.CompilerParams(
            # Both axes are "arbitrary": the phase axis is sequential by design
            # and the batch axis carries the cross-tile BN-statistics reduction
            # (a "parallel" batch axis would silently change training-mode BN).
            dimension_semantics=("arbitrary", "arbitrary"),
            # per-step VMEM footprint is ~1 KB * TILE_N (< 1 MiB at TILE_N=512),
            # so 32 MiB is ample headroom on v5e/v6e and safe on v7x (64 MiB).
            vmem_limit_bytes=32 << 20,
        ),
    )(xt, w1.astype(jnp.float32), w23, w4.astype(jnp.float32), vecs)

    return out_t[:, :n].T                                             # (N, 4)


def init_params(key):
    """PyTorch-default init, PyTorch (out_features, in_features) weight layout."""
    ks = jax.random.split(key, 8)

    def linear(kw, kb, fin, fout):
        bound = 1.0 / (fin ** 0.5)
        w = jax.random.uniform(kw, (fout, fin), jnp.float32, -bound, bound)
        b = jax.random.uniform(kb, (fout,), jnp.float32, -bound, bound)
        return w, b

    w1, b1 = linear(ks[0], ks[1], 6, 32)
    w2, b2 = linear(ks[2], ks[3], 32, 32)
    w3, b3 = linear(ks[4], ks[5], 32, 32)
    w4, b4 = linear(ks[6], ks[7], 32, 4)

    # BatchNorm1d affine params: gamma=1, beta=0 (PyTorch defaults)
    g2 = jnp.ones((32,), jnp.float32)
    be2 = jnp.zeros((32,), jnp.float32)
    g3 = jnp.ones((32,), jnp.float32)
    be3 = jnp.zeros((32,), jnp.float32)

    return (w1, b1, w2, b2, g2, be2, w3, b3, g3, be3, w4, b4)


def reference_forward(x, params):
    """Pure-JAX reference, faithful to the PyTorch training-mode forward."""
    (w1, b1, w2, b2, g2, be2, w3, b3, g3, be3, w4, b4) = params

    def bn(z, g, be):
        m = jnp.mean(z, axis=0, keepdims=True)
        v = jnp.mean((z - m) ** 2, axis=0, keepdims=True)   # biased variance
        return g * (z - m) / jnp.sqrt(v + BN_EPS) + be

    h1 = jnp.maximum(x @ w1.T + b1, 0.0)
    h2 = jnp.maximum(bn(h1 @ w2.T + b2, g2, be2), 0.0)
    h3 = jnp.maximum(bn(h2 @ w3.T + b3, g3, be3), 0.0)
    return jax.nn.sigmoid(h3 @ w4.T + b4)


if __name__ == "__main__":
    key = jax.random.PRNGKey(0)
    kx, kx2, kp = jax.random.split(key, 3)
    params = init_params(kp)

    forward = jax.jit(fully_connected_forward, static_argnames=("tile_n",))

    # case 1: small batch (single tile, padded to 128 lanes)
    batch = 8
    x = jax.random.normal(kx, (batch, 6), jnp.float32)
    out = jax.block_until_ready(forward(x, params))
    ref = reference_forward(x, params)
    assert out.shape == (batch, 4)
    assert jnp.allclose(out, ref, atol=1e-4, rtol=1e-4), \
        float(jnp.max(jnp.abs(out - ref)))

    # case 2: batch that is not a tile multiple -> multiple tiles + masked padding
    batch2 = 300
    x2 = jax.random.normal(kx2, (batch2, 6), jnp.float32)
    out2 = jax.block_until_ready(forward(x2, params, tile_n=128))
    ref2 = reference_forward(x2, params)
    assert out2.shape == (batch2, 4)
    assert jnp.allclose(out2, ref2, atol=1e-4, rtol=1e-4), \
        float(jnp.max(jnp.abs(out2 - ref2)))

    print("KERNEL_OK")
</pallas_src>

<mosaic_0001>
module attributes {stable_mosaic.version = 11 : i64} {
  func.func @kernel(%arg0: i32, %arg1: i32, %arg2: memref<6x128xf32, #tpu.memory_space<vmem>>, %arg3: memref<32x6xf32, #tpu.memory_space<vmem>>, %arg4: memref<2x32x32xf32, #tpu.memory_space<vmem>>, %arg5: memref<4x32xf32, #tpu.memory_space<vmem>>, %arg6: memref<32x8xf32, #tpu.memory_space<vmem>>, %arg7: memref<4x128xf32, #tpu.memory_space<vmem>>, %arg8: memref<32x4xf32, #tpu.memory_space<vmem>>) attributes {dimension_semantics = [#tpu.dimension_semantics<arbitrary>, #tpu.dimension_semantics<arbitrary>], iteration_bounds = array<i64: 3, 1>, scalar_prefetch = 0 : i64, scratch_operands = 1 : i64, tpu.core_type = #tpu.core_type<tc>, window_params = [{transform_indices = @transform_0, window_bounds = array<i64: 6, 128>}, {pipeline_mode = #tpu.pipeline_mode<synchronous>, transform_indices = @transform_1, window_bounds = array<i64: 32, 6>}, {pipeline_mode = #tpu.pipeline_mode<synchronous>, transform_indices = @transform_2, window_bounds = array<i64: 2, 32, 32>}, {pipeline_mode = #tpu.pipeline_mode<synchronous>, transform_indices = @transform_3, window_bounds = array<i64: 4, 32>}, {pipeline_mode = #tpu.pipeline_mode<synchronous>, transform_indices = @transform_4, window_bounds = array<i64: 32, 8>}, {transform_indices = @transform_5, window_bounds = array<i64: 4, 128>}]} {
    %c0_i32 = arith.constant 0 : i32
    %0 = arith.cmpi eq, %arg0, %c0_i32 : i32
    %c0_i32_0 = arith.constant 0 : i32
    %1 = arith.cmpi eq, %arg1, %c0_i32_0 : i32
    %2 = arith.andi %0, %1 : i1
    %3 = arith.extui %2 : i1 to i32
    %c0_i32_1 = arith.constant 0 : i32
    %4 = arith.cmpi ne, %3, %c0_i32_1 : i32
    scf.if %4 {
      %cst_28 = arith.constant 0.000000e+00 : f32
      %43 = vector.broadcast %cst_28 : f32 to vector<32x4xf32>
      %c0_29 = arith.constant 0 : index
      %c0_30 = arith.constant 0 : index
      %44 = vector.load %arg8[%c0_29, %c0_30] : memref<32x4xf32, #tpu.memory_space<vmem>>, vector<32x4xf32>
      tpu.vector_store %arg8[%c0_29, %c0_30], %43 {strides = array<i32>} : memref<32x4xf32, #tpu.memory_space<vmem>>, vector<32x4xf32>,
    } else {
    }
    %c0 = arith.constant 0 : index
    %c0_2 = arith.constant 0 : index
    %5 = vector.load %arg3[%c0, %c0_2] : memref<32x6xf32, #tpu.memory_space<vmem>>, vector<32x6xf32>
    %c0_3 = arith.constant 0 : index
    %c0_4 = arith.constant 0 : index
    %c0_5 = arith.constant 0 : index
    %6 = vector.load %arg4[%c0_3, %c0_4, %c0_5] : memref<2x32x32xf32, #tpu.memory_space<vmem>>, vector<1x32x32xf32>
    %7 = vector.shape_cast %6 : vector<1x32x32xf32> to vector<32x32xf32>
    %c1 = arith.constant 1 : index
    %c0_6 = arith.constant 0 : index
    %c0_7 = arith.constant 0 : index
    %8 = vector.load %arg4[%c1, %c0_6, %c0_7] : memref<2x32x32xf32, #tpu.memory_space<vmem>>, vector<1x32x32xf32>
    %9 = vector.shape_cast %8 : vector<1x32x32xf32> to vector<32x32xf32>
    %c0_8 = arith.constant 0 : index
    %c0_9 = arith.constant 0 : index
    %10 = vector.load %arg5[%c0_8, %c0_9] : memref<4x32xf32, #tpu.memory_space<vmem>>, vector<4x32xf32>
    %c0_10 = arith.constant 0 : index
    %c0_11 = arith.constant 0 : index
    %11 = vector.load %arg6[%c0_10, %c0_11] : memref<32x8xf32, #tpu.memory_space<vmem>>, vector<32x1xf32>
    %c0_12 = arith.constant 0 : index
    %c1_13 = arith.constant 1 : index
    %12 = vector.load %arg6[%c0_12, %c1_13] : memref<32x8xf32, #tpu.memory_space<vmem>>, vector<32x1xf32>
    %c0_14 = arith.constant 0 : index
    %c2 = arith.constant 2 : index
    %13 = vector.load %arg6[%c0_14, %c2] : memref<32x8xf32, #tpu.memory_space<vmem>>, vector<32x1xf32>
    %c0_15 = arith.constant 0 : index
    %c3 = arith.constant 3 : index
    %14 = vector.load %arg6[%c0_15, %c3] : memref<32x8xf32, #tpu.memory_space<vmem>>, vector<32x1xf32>
    %c0_16 = arith.constant 0 : index
    %c4 = arith.constant 4 : index
    %15 = vector.load %arg6[%c0_16, %c4] : memref<32x8xf32, #tpu.memory_space<vmem>>, vector<32x1xf32>
    %c0_17 = arith.constant 0 : index
    %c5 = arith.constant 5 : index
    %16 = vector.load %arg6[%c0_17, %c5] : memref<32x8xf32, #tpu.memory_space<vmem>>, vector<32x1xf32>
    %c0_18 = arith.constant 0 : index
    %c6 = arith.constant 6 : index
    %17 = vector.load %arg6[%c0_18, %c6] : memref<32x8xf32, #tpu.memory_space<vmem>>, vector<32x1xf32>
    %c0_19 = arith.constant 0 : index
    %c7 = arith.constant 7 : index
    %18 = vector.load %arg6[%c0_19, %c7] : memref<32x8xf32, #tpu.memory_space<vmem>>, vector<4x1xf32>
    %c128_i32 = arith.constant 128 : i32
    %19 = arith.muli %arg1, %c128_i32 : i32
    %20 = tpu.iota {dimensions = array<i32: 1>} : vector<32x128xi32>
    %21 = vector.broadcast %19 : i32 to vector<32x128xi32>
    %22 = arith.addi %21, %20 : vector<32x128xi32>
    %c8_i32 = arith.constant 8 : i32
    %23 = vector.broadcast %c8_i32 : i32 to vector<32x128xi32>
    %24 = arith.cmpi slt, %22, %23 : vector<32x128xi32>
    %c0_20 = arith.constant 0 : index
    %c0_21 = arith.constant 0 : index
    %25 = vector.load %arg2[%c0_20, %c0_21] : memref<6x128xf32, #tpu.memory_space<vmem>>, vector<6x128xf32>
    %cst = arith.constant dense<0.000000e+00> : vector<32x128xf32>
    %26 = tpu.matmul %5, %25, %cst {dimension_numbers = #tpu.dot_dimension_numbers<[1], [0], [0], [1], [0, 0, 1, 1], [], []>} : vector<32x6xf32>, vector<6x128xf32>, vector<32x128xf32> -> vector<32x128xf32>
    %27 = vector.broadcast %11 : vector<32x1xf32> to vector<32x128xf32>
    %28 = arith.addf %26, %27 : vector<32x128xf32>
    %cst_22 = arith.constant 0.000000e+00 : f32
    %29 = vector.broadcast %cst_22 : f32 to vector<32x128xf32>
    %30 = arith.maximumf %28, %29 : vector<32x128xf32>
    %cst_23 = arith.constant dense<0.000000e+00> : vector<32x128xf32>
    %31 = tpu.matmul %7, %30, %cst_23 {dimension_numbers = #tpu.dot_dimension_numbers<[1], [0], [0], [1], [0, 0, 1, 1], [], []>} : vector<32x32xf32>, vector<32x128xf32>, vector<32x128xf32> -> vector<32x128xf32>
    %32 = vector.broadcast %12 : vector<32x1xf32> to vector<32x128xf32>
    %33 = arith.addf %31, %32 : vector<32x128xf32>
    %c0_i32_24 = arith.constant 0 : i32
    %34 = arith.cmpi eq, %arg0, %c0_i32_24 : i32
    %35 = arith.extui %34 : i1 to i32
    %c0_i32_25 = arith.constant 0 : i32
    %36 = arith.cmpi ne, %35, %c0_i32_25 : i32
    scf.if %36 {
      %cst_28 = arith.constant 0.000000e+00 : f32
      %43 = vector.broadcast %cst_28 : f32 to vector<32x128xf32>
      %44 = arith.select %24, %33, %43 : vector<32x128xi1>, vector<32x128xf32>
      %c0_29 = arith.constant 0 : index
      %c0_30 = arith.constant 0 : index
      %45 = vector.load %arg8[%c0_29, %c0_30] : memref<32x4xf32, #tpu.memory_space<vmem>>, vector<32x1xf32>
      %cst_31 = arith.constant dense<0.000000e+00> : vector<32xf32>
      %46 = vector.multi_reduction <add>, %44, %cst_31 [1] : vector<32x128xf32> to vector<32xf32>
      %47 = vector.shape_cast %46 : vector<32xf32> to vector<32x1xf32>
      %48 = arith.addf %45, %47 : vector<32x1xf32>
      %c0_32 = arith.constant 0 : index
      %c0_33 = arith.constant 0 : index
      %49 = vector.load %arg8[%c0_32, %c0_33] : memref<32x4xf32, #tpu.memory_space<vmem>>, vector<32x1xf32>
      tpu.vector_store %arg8[%c0_32, %c0_33], %48 {strides = array<i32>} : memref<32x4xf32, #tpu.memory_space<vmem>>, vector<32x1xf32>,
      %c0_34 = arith.constant 0 : index
      %c1_35 = arith.constant 1 : index
      %50 = vector.load %arg8[%c0_34, %c1_35] : memref<32x4xf32, #tpu.memory_space<vmem>>, vector<32x1xf32>
      %51 = arith.mulf %44, %44 : vector<32x128xf32>
      %cst_36 = arith.constant dense<0.000000e+00> : vector<32xf32>
      %52 = vector.multi_reduction <add>, %51, %cst_36 [1] : vector<32x128xf32> to vector<32xf32>
      %53 = vector.shape_cast %52 : vector<32xf32> to vector<32x1xf32>
      %54 = arith.addf %50, %53 : vector<32x1xf32>
      %c0_37 = arith.constant 0 : index
      %c1_38 = arith.constant 1 : index
      %55 = vector.load %arg8[%c0_37, %c1_38] : memref<32x4xf32, #tpu.memory_space<vmem>>, vector<32x1xf32>
      tpu.vector_store %arg8[%c0_37, %c1_38], %54 {strides = array<i32>} : memref<32x4xf32, #tpu.memory_space<vmem>>, vector<32x1xf32>,
    } else {
    }
    %c1_i32 = arith.constant 1 : i32
    %37 = arith.cmpi eq, %arg0, %c1_i32 : i32
    %38 = arith.extui %37 : i1 to i32
    %c0_i32_26 = arith.constant 0 : i32
    %39 = arith.cmpi ne, %38, %c0_i32_26 : i32
    scf.if %39 {
      %c0_28 = arith.constant 0 : index
      %c0_29 = arith.constant 0 : index
      %43 = vector.load %arg8[%c0_28, %c0_29] : memref<32x4xf32, #tpu.memory_space<vmem>>, vector<32x1xf32>
      %cst_30 = arith.constant 1.250000e-01 : f32
      %44 = vector.broadcast %cst_30 : f32 to vector<32x1xf32>
      %45 = arith.mulf %43, %44 : vector<32x1xf32>
      %c0_31 = arith.constant 0 : index
      %c1_32 = arith.constant 1 : index
      %46 = vector.load %arg8[%c0_31, %c1_32] : memref<32x4xf32, #tpu.memory_space<vmem>>, vector<32x1xf32>
      %cst_33 = arith.constant 1.250000e-01 : f32
      %47 = vector.broadcast %cst_33 : f32 to vector<32x1xf32>
      %48 = arith.mulf %46, %47 : vector<32x1xf32>
      %49 = arith.mulf %45, %45 : vector<32x1xf32>
      %50 = arith.subf %48, %49 : vector<32x1xf32>
      %51 = vector.broadcast %45 : vector<32x1xf32> to vector<32x128xf32>
      %52 = arith.subf %33, %51 : vector<32x128xf32>
      %cst_34 = arith.constant 9.99999974E-6 : f32
      %53 = vector.broadcast %cst_34 : f32 to vector<32x1xf32>
      %54 = arith.addf %50, %53 : vector<32x1xf32>
      %55 = math.rsqrt %54 : vector<32x1xf32>
      %56 = vector.broadcast %55 : vector<32x1xf32> to vector<32x128xf32>
      %57 = arith.mulf %52, %56 : vector<32x128xf32>
      %58 = vector.broadcast %13 : vector<32x1xf32> to vector<32x128xf32>
      %59 = arith.mulf %58, %57 : vector<32x128xf32>
      %60 = vector.broadcast %14 : vector<32x1xf32> to vector<32x128xf32>
      %61 = arith.addf %59, %60 : vector<32x128xf32>
      %cst_35 = arith.constant 0.000000e+00 : f32
      %62 = vector.broadcast %cst_35 : f32 to vector<32x128xf32>
      %63 = arith.maximumf %61, %62 : vector<32x128xf32>
      %cst_36 = arith.constant dense<0.000000e+00> : vector<32x128xf32>
      %64 = tpu.matmul %9, %63, %cst_36 {dimension_numbers = #tpu.dot_dimension_numbers<[1], [0], [0], [1], [0, 0, 1, 1], [], []>} : vector<32x32xf32>, vector<32x128xf32>, vector<32x128xf32> -> vector<32x128xf32>
      %65 = vector.broadcast %15 : vector<32x1xf32> to vector<32x128xf32>
      %66 = arith.addf %64, %65 : vector<32x128xf32>
      %cst_37 = arith.constant 0.000000e+00 : f32
      %67 = vector.broadcast %cst_37 : f32 to vector<32x128xf32>
      %68 = arith.select %24, %66, %67 : vector<32x128xi1>, vector<32x128xf32>
      %c0_38 = arith.constant 0 : index
      %c2_39 = arith.constant 2 : index
      %69 = vector.load %arg8[%c0_38, %c2_39] : memref<32x4xf32, #tpu.memory_space<vmem>>, vector<32x1xf32>
      %cst_40 = arith.constant dense<0.000000e+00> : vector<32xf32>
      %70 = vector.multi_reduction <add>, %68, %cst_40 [1] : vector<32x128xf32> to vector<32xf32>
      %71 = vector.shape_cast %70 : vector<32xf32> to vector<32x1xf32>
      %72 = arith.addf %69, %71 : vector<32x1xf32>
      %c0_41 = arith.constant 0 : index
      %c2_42 = arith.constant 2 : index
      %73 = vector.load %arg8[%c0_41, %c2_42] : memref<32x4xf32, #tpu.memory_space<vmem>>, vector<32x1xf32>
      tpu.vector_store %arg8[%c0_41, %c2_42], %72 {strides = array<i32>} : memref<32x4xf32, #tpu.memory_space<vmem>>, vector<32x1xf32>,
      %c0_43 = arith.constant 0 : index
      %c3_44 = arith.constant 3 : index
      %74 = vector.load %arg8[%c0_43, %c3_44] : memref<32x4xf32, #tpu.memory_space<vmem>>, vector<32x1xf32>
      %75 = arith.mulf %68, %68 : vector<32x128xf32>
      %cst_45 = arith.constant dense<0.000000e+00> : vector<32xf32>
      %76 = vector.multi_reduction <add>, %75, %cst_45 [1] : vector<32x128xf32> to vector<32xf32>
      %77 = vector.shape_cast %76 : vector<32xf32> to vector<32x1xf32>
      %78 = arith.addf %74, %77 : vector<32x1xf32>
      %c0_46 = arith.constant 0 : index
      %c3_47 = arith.constant 3 : index
      %79 = vector.load %arg8[%c0_46, %c3_47] : memref<32x4xf32, #tpu.memory_space<vmem>>, vector<32x1xf32>
      tpu.vector_store %arg8[%c0_46, %c3_47], %78 {strides = array<i32>} : memref<32x4xf32, #tpu.memory_space<vmem>>, vector<32x1xf32>,
    } else {
    }
    %c2_i32 = arith.constant 2 : i32
    %40 = arith.cmpi eq, %arg0, %c2_i32 : i32
    %41 = arith.extui %40 : i1 to i32
    %c0_i32_27 = arith.constant 0 : i32
    %42 = arith.cmpi ne, %41, %c0_i32_27 : i32
    scf.if %42 {
      %c0_28 = arith.constant 0 : index
      %c0_29 = arith.constant 0 : index
      %43 = vector.load %arg8[%c0_28, %c0_29] : memref<32x4xf32, #tpu.memory_space<vmem>>, vector<32x1xf32>
      %cst_30 = arith.constant 1.250000e-01 : f32
      %44 = vector.broadcast %cst_30 : f32 to vector<32x1xf32>
      %45 = arith.mulf %43, %44 : vector<32x1xf32>
      %c0_31 = arith.constant 0 : index
      %c1_32 = arith.constant 1 : index
      %46 = vector.load %arg8[%c0_31, %c1_32] : memref<32x4xf32, #tpu.memory_space<vmem>>, vector<32x1xf32>
      %cst_33 = arith.constant 1.250000e-01 : f32
      %47 = vector.broadcast %cst_33 : f32 to vector<32x1xf32>
      %48 = arith.mulf %46, %47 : vector<32x1xf32>
      %49 = arith.mulf %45, %45 : vector<32x1xf32>
      %50 = arith.subf %48, %49 : vector<32x1xf32>
      %51 = vector.broadcast %45 : vector<32x1xf32> to vector<32x128xf32>
      %52 = arith.subf %33, %51 : vector<32x128xf32>
      %cst_34 = arith.constant 9.99999974E-6 : f32
      %53 = vector.broadcast %cst_34 : f32 to vector<32x1xf32>
      %54 = arith.addf %50, %53 : vector<32x1xf32>
      %55 = math.rsqrt %54 : vector<32x1xf32>
      %56 = vector.broadcast %55 : vector<32x1xf32> to vector<32x128xf32>
      %57 = arith.mulf %52, %56 : vector<32x128xf32>
      %58 = vector.broadcast %13 : vector<32x1xf32> to vector<32x128xf32>
      %59 = arith.mulf %58, %57 : vector<32x128xf32>
      %60 = vector.broadcast %14 : vector<32x1xf32> to vector<32x128xf32>
      %61 = arith.addf %59, %60 : vector<32x128xf32>
      %cst_35 = arith.constant 0.000000e+00 : f32
      %62 = vector.broadcast %cst_35 : f32 to vector<32x128xf32>
      %63 = arith.maximumf %61, %62 : vector<32x128xf32>
      %cst_36 = arith.constant dense<0.000000e+00> : vector<32x128xf32>
      %64 = tpu.matmul %9, %63, %cst_36 {dimension_numbers = #tpu.dot_dimension_numbers<[1], [0], [0], [1], [0, 0, 1, 1], [], []>} : vector<32x32xf32>, vector<32x128xf32>, vector<32x128xf32> -> vector<32x128xf32>
      %65 = vector.broadcast %15 : vector<32x1xf32> to vector<32x128xf32>
      %66 = arith.addf %64, %65 : vector<32x128xf32>
      %c0_37 = arith.constant 0 : index
      %c2_38 = arith.constant 2 : index
      %67 = vector.load %arg8[%c0_37, %c2_38] : memref<32x4xf32, #tpu.memory_space<vmem>>, vector<32x1xf32>
      %cst_39 = arith.constant 1.250000e-01 : f32
      %68 = vector.broadcast %cst_39 : f32 to vector<32x1xf32>
      %69 = arith.mulf %67, %68 : vector<32x1xf32>
      %c0_40 = arith.constant 0 : index
      %c3_41 = arith.constant 3 : index
      %70 = vector.load %arg8[%c0_40, %c3_41] : memref<32x4xf32, #tpu.memory_space<vmem>>, vector<32x1xf32>
      %cst_42 = arith.constant 1.250000e-01 : f32
      %71 = vector.broadcast %cst_42 : f32 to vector<32x1xf32>
      %72 = arith.mulf %70, %71 : vector<32x1xf32>
      %73 = arith.mulf %69, %69 : vector<32x1xf32>
      %74 = arith.subf %72, %73 : vector<32x1xf32>
      %75 = vector.broadcast %69 : vector<32x1xf32> to vector<32x128xf32>
      %76 = arith.subf %66, %75 : vector<32x128xf32>
      %cst_43 = arith.constant 9.99999974E-6 : f32
      %77 = vector.broadcast %cst_43 : f32 to vector<32x1xf32>
      %78 = arith.addf %74, %77 : vector<32x1xf32>
      %79 = math.rsqrt %78 : vector<32x1xf32>
      %80 = vector.broadcast %79 : vector<32x1xf32> to vector<32x128xf32>
      %81 = arith.mulf %76, %80 : vector<32x128xf32>
      %82 = vector.broadcast %16 : vector<32x1xf32> to vector<32x128xf32>
      %83 = arith.mulf %82, %81 : vector<32x128xf32>
      %84 = vector.broadcast %17 : vector<32x1xf32> to vector<32x128xf32>
      %85 = arith.addf %83, %84 : vector<32x128xf32>
      %cst_44 = arith.constant 0.000000e+00 : f32
      %86 = vector.broadcast %cst_44 : f32 to vector<32x128xf32>
      %87 = arith.maximumf %85, %86 : vector<32x128xf32>
      %cst_45 = arith.constant dense<0.000000e+00> : vector<4x128xf32>
      %88 = tpu.matmul %10, %87, %cst_45 {dimension_numbers = #tpu.dot_dimension_numbers<[1], [0], [0], [1], [0, 0, 1, 1], [], []>} : vector<4x32xf32>, vector<32x128xf32>, vector<4x128xf32> -> vector<4x128xf32>
      %89 = vector.broadcast %18 : vector<4x1xf32> to vector<4x128xf32>
      %90 = arith.addf %88, %89 : vector<4x128xf32>
      %cst_46 = arith.constant 0.000000e+00 : f32
      %91 = vector.broadcast %cst_46 : f32 to vector<4x128xf32>
      %92 = arith.subf %91, %90 : vector<4x128xf32>
      %93 = math.exp %92 : vector<4x128xf32>
      %cst_47 = arith.constant 1.000000e+00 : f32
      %94 = vector.broadcast %cst_47 : f32 to vector<4x128xf32>
      %95 = arith.addf %94, %93 : vector<4x128xf32>
      %96 = tpu.reciprocal %95 : vector<4x128xf32> -> vector<4x128xf32>
      %c0_48 = arith.constant 0 : index
      %c0_49 = arith.constant 0 : index
      %97 = vector.load %arg7[%c0_48, %c0_49] : memref<4x128xf32, #tpu.memory_space<vmem>>, vector<4x128xf32>
      tpu.vector_store %arg7[%c0_48, %c0_49], %96 {strides = array<i32>} : memref<4x128xf32, #tpu.memory_space<vmem>>, vector<4x128xf32>,
    } else {
    }
    return
  }
  func.func @transform_0(%arg0: i32, %arg1: i32) -> (i32, i32) {
    %c0_i32 = arith.constant 0 : i32
    %c0_i32_0 = arith.constant 0 : i32
    return %c0_i32, %arg1 : i32, i32
  }
  func.func @transform_1(%arg0: i32, %arg1: i32) -> (i32, i32) {
    %c0_i32 = arith.constant 0 : i32
    %c0_i32_0 = arith.constant 0 : i32
    %c0_i32_1 = arith.constant 0 : i32
    return %c0_i32, %c0_i32_0 : i32, i32
  }
  func.func @transform_2(%arg0: i32, %arg1: i32) -> (i32, i32, i32) {
    %c0_i32 = arith.constant 0 : i32
    %c0_i32_0 = arith.constant 0 : i32
    %c0_i32_1 = arith.constant 0 : i32
    %c0_i32_2 = arith.constant 0 : i32
    return %c0_i32, %c0_i32_0, %c0_i32_1 : i32, i32, i32
  }
  func.func @transform_3(%arg0: i32, %arg1: i32) -> (i32, i32) {
    %c0_i32 = arith.constant 0 : i32
    %c0_i32_0 = arith.constant 0 : i32
    %c0_i32_1 = arith.constant 0 : i32
    return %c0_i32, %c0_i32_0 : i32, i32
  }
  func.func @transform_4(%arg0: i32, %arg1: i32) -> (i32, i32) {
    %c0_i32 = arith.constant 0 : i32
    %c0_i32_0 = arith.constant 0 : i32
    %c0_i32_1 = arith.constant 0 : i32
    return %c0_i32, %c0_i32_0 : i32, i32
  }
  func.func @transform_5(%arg0: i32, %arg1: i32) -> (i32, i32) {
    %c0_i32 = arith.constant 0 : i32
    %c0_i32_0 = arith.constant 0 : i32
    return %c0_i32, %arg1 : i32, i32
  }
}

</mosaic_0001>

<bundles_post_ra>
// kernel: fully_connected_forward.1
= control target key start
LH: loop header
LB: loop body
LE: loop exit
PB: predicated region body
PF: predicated region fallthrough
CT: control target
= control target key end

     0   :  { %s1684_s18 = smov 0   ;;  %s1686_s19 = smov 0   ;;  %s1953_s0 = inlined_call_operand.vmem [shape: f32[6,128], index: 0, kind: input, shape index: {}]   ;;  %s1954_s1 = inlined_call_operand.vmem [shape: f32[32,6], index: 1, kind: input, shape index: {}]   ;;  %s1955_s2 = inlined_call_operand.vmem [shape: f32[2,32,32], index: 2, kind: input, shape index: {}]   ;;  %s1956_s3 = inlined_call_operand.vmem [shape: f32[4,32], index: 3, kind: input, shape index: {}]   ;;  %s1957_s4 = inlined_call_operand.vmem [shape: f32[32,8], index: 4, kind: input, shape index: {}]   ;;  %s1958_s5 = inlined_call_operand.vmem [shape: f32[4,128], index: 5, kind: output, shape index: {}]  }
   0x1   :  { %s1688_s20 = smov 0  }
   0x2 LB: > { %s27_s21 = sadd.s32 1, %s1627_s19  ;;  %p1339_p0 = scmp.ge.s32.totalorder %s1631_s20, 1  ;;  %s1631_s20 = sphi %s1688_s20, %s15_s20   ;;  %s1627_s19 = sphi %s1686_s19, %s1960_s19   ;;  %s1623_s18 = sphi %s1684_s18, %s1959_s18  }
   0x3   : > { %p29_p1 = scmp.ge.s32.totalorder %s27_s21, 3  ;;  %p198_p2 = scmp.lt.s32.totalorder %s1631_s20, 4 }
   0x5   : > { %s1962_s21 = smov (%p29_p1, %s27_s21), 0  ;;  %p199_p3 = pnand %p1339_p0, %p198_p2 }
   0x6   : > { %p232_p4 = scmp.eq.s32.totalorder (!%p199_p3), %s1623_s18, 0 }
   0x7   : > { %202 = sbr.rel (%p199_p3) target bundleno = 2057 (0x809), region = 40 }
   0xe   : > { %237 = sbr.rel (!%p232_p4) target bundleno = 21 (0x15), region = 44  ;;  %vm238_vm0 = vcmask (%p232_p4), 31744   ;;  %v1633_v0 = vmov (%p232_p4), 0.0  }
   0xf   : > { %239 = vst.msk [vmem:[#allocation2] sm:$0xff] (%p232_p4), %vm238_vm0, %v1633_v0  ;;  %240 = vst.msk [vmem:[#allocation2 + $0x8] sm:$0xff] (%p232_p4), %vm238_vm0, %v1633_v0 }
  0x10   : > { %241 = vst.msk [vmem:[#allocation2 + $0x10] sm:$0xff] (%p232_p4), %vm238_vm0, %v1633_v0  ;;  %242 = vst.msk [vmem:[#allocation2 + $0x18] sm:$0xff] (%p232_p4), %vm238_vm0, %v1633_v0 }
  0x15 PF: > { %v1708_v1 = vld [vmem:[%s1955_s2 + $0x20] sm:$0xff]  ;;  %v1713_v2 = vld [vmem:[%s1955_s2 + $0x28] sm:$0xff]  ;;  %v1718_v3 = vld [vmem:[%s1955_s2 + $0x30] sm:$0xff]  ;;  %v263_v4 = vlaneseq  ;;  %vm302_vm1 = vcmask 1045504   ;;  %vm289_vm2 = vcmask 48128   ;;  %v1634_v8 = vmov 0  }
  0x16   : > { %v1723_v5 = vld [vmem:[%s1955_s2 + $0x38] sm:$0xff]  ;;  %v1728_v6 = vld [vmem:[%s1956_s3] sm:$0xf]  ;;  %1548 = vset.pattern.permute.xlu0 %v1634_v8  ;;  %1549 = vset.pattern.permute.xlu1 %v1634_v8  ;;  %v244_v12 = vld [vmem:[%s1954_s1 + $0x8] sm:$0xff]  ;;  %vm411_vm4 = vcmask 261120   ;;  %v1635_v21 = vmov 1  }
  0x17   : > { %v1733_v7 = vld [vmem:[%s1957_s4] sm:$0xf]  ;;  %v1735_v9 = vand.u32 127, %v263_v4  ;;  %v245_v13 = vld [vmem:[%s1954_s1 + $0x10] sm:$0xff]  ;;  %v1769_v16 = vld [vmem:[%s1957_s4 + $0x8] sm:$0xff]  ;;  %p1354_p5 = scmp.ne.s32.totalorder %s1623_s18, 0 }
  0x18   : > { %v268_v10 = vld [vmem:[%s1953_s0] sm:$0x3f]  ;;  %v1762_v15 = vld [vmem:[%s1957_s4 + $0x10] sm:$0xff]  ;;  %v246_v17 = vld [vmem:[%s1954_s1 + $0x18] sm:$0xff]  ;;  %vm532_vm5 = vcmask (!%p1354_p5), 7168   ;;  %vm557_vm6 = vcmask (!%p1354_p5), 15368  }
  0x19   : > { %v243_v11 = vld [vmem:[%s1954_s1] sm:$0xff]  ;;  %1404 = vmatprep.subr.msk.mxu0 %vm302_vm1, %v268_v10  ;;  %vm267_vm3 = vcmp.lt.s32.totalorder %v1735_v9, 8  ;;  %281 = vperm.xlu1 %1549, %v1762_v15   ;;  %v1778_v18 = vld [vmem:[%s1957_s4 + $0x18] sm:$0xff]  ;;  %v249_v20 = vld [vmem:[%s1955_s2 + $0x10] sm:$0xff] }
  0x1a   : > { %1406 = vmatprep.mubr.msk.f32.mxu0 %vm289_vm2, %v243_v11  ;;  %v1754_v14 = vld [vmem:[%s1957_s4] sm:$0xff]  ;;  %1405 = vmatpush3.msk.msra.mxu0 %vm302_vm1, %v268_v10  ;;  %v248_v40 = vld [vmem:[%s1955_s2 + $0x8] sm:$0xff]  ;;  %v250_v41 = vld [vmem:[%s1955_s2 + $0x18] sm:$0xff] }
  0x1b   : > { %271 = vperm.xlu0 %1548, %v1754_v14   ;;  %1407 = vmatmul.mubr.msk.f32.vlgmr.msra.gmra.mrb[0].mxu0 %vm289_vm2, %v244_v12  ;;  %v247_v19 = vld [vmem:[%s1955_s2] sm:$0xff]  ;;  %v518_v62 = vld [vmem:[#allocation2 + $0x10] sm:$0xff] (!%p1354_p5)  ;;  %v519_v11 = vld [vmem:[#allocation2 + $0x18] sm:$0xff] (!%p1354_p5) }
  0x1c   : > { %1409 = vmatprep.mubr.msk.f32.mxu0 %vm289_vm2, %v245_v13  ;;  %1423 = vmatprep.mubr.msk.f32.mxu1 %vm411_vm4, %v249_v20  ;;  %v516_v63 = vld [vmem:[#allocation2] sm:$0xff] (!%p1354_p5)  ;;  %v517_v12 = vld [vmem:[#allocation2 + $0x8] sm:$0xff] (!%p1354_p5) }
  0x1d   : > { %286 = vperm.xlu1 %1549, %v1778_v18  }
  0x1f   : > { %276 = vperm.xlu0 %1548, %v1769_v16   ;;  %1410 = vmatmul.mubr.msk.f32.gmra.mrb[2].mxu0 %vm289_vm2, %v246_v17 }
  0x20   : > { %1420 = vmatprep.mubr.msk.f32.mxu0 %vm411_vm4, %v247_v19 }
  0x21   : > { %1551 = vset.pattern.permute.xlu1 %v1635_v21 }
  0x22   : > { %400 = vperm.xlu1 %1551, %v1769_v16  }
  0x23   : > { %1550 = vset.pattern.permute.xlu0 %v1635_v21 }
  0x24   : > { %396 = vperm.xlu0 %1550, %v1754_v14  }
  0x26   : > { %404 = vperm.xlu1 %1551, %v1762_v15  }
  0x28   : > { %408 = vperm.xlu0 %1550, %v1778_v18  }
  0x98   : > { %v282_v23 = vpop.permute.xlu1 %281 }
  0x9a   : > { %v272_v22 = vpop.permute.xlu0 %271 }
  0x9c   : > { %v287_v30 = vpop.permute.xlu1 %286 }
  0x9e   : > { %v277_v24 = vpop.permute.xlu0 %276 }
  0xa1   : > { %v401_v42 = vpop.permute.xlu1 %400 }
  0xa3   : > { %v397_v43 = vpop.permute.xlu0 %396 }
  0xa5   : > { %v405_v44 = vpop.permute.xlu1 %404 }
  0xa7   : > { %v409_v45 = vpop.permute.xlu0 %408 }
  0xee   : > { %v1408_v25 = vpop.f32.mrb[0].mxu0 }
  0xef   : > { %v378_v26 = vadd.f32 %v1408_v25, %v277_v24  ;;  %v372_v27 = vpop.f32.mrb[1].mxu0 }
  0xf0   : > { %v373_v28 = vadd.f32 %v372_v27, %v272_v22 }
  0xf1   : > { %v392_v29 = vmax.f32 %v378_v26, 0.0 }
  0xf2   : > { %v391_v31 = vmax.f32 %v373_v28, 0.0  ;;  %v1411_v32 = vpop.f32.mrb[2].mxu0 }
  0xf3   : > { %v388_v33 = vadd.f32 %v1411_v32, %v287_v30  ;;  %v382_v34 = vpop.f32.mrb[3].mxu0 }
  0xf4   : > { %v1465_v35 = vpack.c.bf16 %v392_v29, %v391_v31  ;;  %v383_v36 = vadd.f32 %v382_v34, %v282_v23 }
  0xf5   : > { %v394_v37 = vmax.f32 %v388_v33, 0.0 }
  0xf6   : > { %v393_v38 = vmax.f32 %v383_v36, 0.0  ;;  %1466 = vmatprep.subr.bf16.mxu0 %v1465_v35  ;;  %1495 = vmatprep.subr.bf16.mxu1 %v1465_v35 }
  0xf7   : > { %1468 = vmatpush3.bf16.msra.mxu0 %v1465_v35  ;;  %1497 = vmatpush3.bf16.msra.mxu1 %v1465_v35 }
  0xf8   : > { %v1469_v39 = vpack.c.bf16 %v394_v37, %v393_v38 }
  0xfa   : > { %1470 = vmatprep.subr.bf16.mxu0 %v1469_v39  ;;  %1496 = vmatprep.subr.bf16.mxu1 %v1469_v39 }
  0xfb   : > { %1472 = vmatpush3.bf16.msra.mxu0 %v1469_v39  ;;  %1498 = vmatpush3.bf16.msra.mxu1 %v1469_v39 }
  0xfe   : > { %1421 = vmatmul.mubr.msk.f32.vlgmr.msra.gmra.mrb[4].mxu0 %vm411_vm4, %v248_v40  ;;  %1424 = vmatmul.mubr.msk.f32.vlgmr.msra.gmra.mrb[0].mxu1 %vm411_vm4, %v250_v41 }
 0x1cd   : > { %511 = sbr.rel (%p1354_p5) target bundleno = 629 (0x275), region = 48 }
 0x1d1   : > { %v1422_v46 = vpop.f32.mrb[4].mxu0  ;;  %v1425_v47 = vpop.f32.mrb[0].mxu1 }
 0x1d2   : > { %v1803_v48 = vadd.f32 %v1422_v46, %v401_v42  ;;  %v1805_v49 = vadd.f32 %v1425_v47, %v409_v45  ;;  %v490_v50 = vpop.f32.mrb[5].mxu0  ;;  %v500_v51 = vpop.f32.mrb[1].mxu1 }
 0x1d3   : > { %v1807_v52 = vadd.f32 %v490_v50, %v397_v43  ;;  %v1809_v53 = vadd.f32 %v500_v51, %v405_v44 }
 0x1d4   : > { %v515_v56 = vsel %vm267_vm3, %v1805_v49, 0.0  ;;  %v513_v57 = vsel %vm267_vm3, %v1803_v48, 0.0 }
 0x1d5   : > { %v514_v54 = vsel %vm267_vm3, %v1809_v53, 0.0  ;;  %v512_v55 = vsel %vm267_vm3, %v1807_v52, 0.0  ;;  %v542_v59 = vmul.f32 %v513_v57, %v513_v57  ;;  %v544_v61 = vmul.f32 %v515_v56, %v515_v56 }
 0x1d6   : > { %524 = vadd.xlane.f32.xlu1 %v514_v54  ;;  %520 = vadd.xlane.f32.xlu0 %v512_v55  ;;  %v541_v58 = vmul.f32 %v512_v55, %v512_v55  ;;  %v543_v60 = vmul.f32 %v514_v54, %v514_v54 }
 0x1da   : > { %526 = vadd.xlane.f32.xlu1 %v515_v56  ;;  %522 = vadd.xlane.f32.xlu0 %v513_v57 }
 0x1de   : > { %545 = vadd.xlane.f32.xlu0 %v541_v58  ;;  %547 = vadd.xlane.f32.xlu1 %v542_v59 }
 0x1e2   : > { %549 = vadd.xlane.f32.xlu0 %v543_v60  ;;  %551 = vadd.xlane.f32.xlu1 %v544_v61 }
 0x263   : > { %v525_v0 = vpop.xlane.xlu1 %524  ;;  %v521_v4 = vpop.xlane.xlu0 %520 }
 0x264   : > { %v530_v8 = vadd.f32 %v525_v0, %v518_v62  ;;  %v528_v10 = vadd.f32 %v521_v4, %v516_v63 }
 0x266   : > { %535 = vst.msk [vmem:[#allocation2 + $0x10] sm:$0xff] %vm532_vm5, %v530_v8  ;;  %533 = vst.msk [vmem:[#allocation2] sm:$0xff] %vm532_vm5, %v528_v10 }
 0x267   : > { %v527_v13 = vpop.xlane.xlu1 %526  ;;  %v523_v17 = vpop.xlane.xlu0 %522 }
 0x268   : > { %v531_v19 = vadd.f32 %v527_v13, %v519_v11  ;;  %v529_v20 = vadd.f32 %v523_v17, %v517_v12 }
 0x26a   : > { %536 = vst.msk [vmem:[#allocation2 + $0x18] sm:$0xff] %vm532_vm5, %v531_v19  ;;  %534 = vst.msk [vmem:[#allocation2 + $0x8] sm:$0xff] %vm532_vm5, %v529_v20 }
 0x26b   : > { %v546_v21 = vpop.xlane.xlu0 %545  ;;  %v548_v22 = vpop.xlane.xlu1 %547 }
 0x26d   : > { %v537_v23 = vld [vmem:[#allocation2] sm:$0xff]  ;;  %v539_v25 = vld [vmem:[#allocation2 + $0x10] sm:$0xff] }
 0x26e   : > { %v553_v24 = vadd.f32 %v546_v21, %v537_v23 }
 0x26f   : > { %v550_v26 = vpop.xlane.xlu0 %549  ;;  %v552_v27 = vpop.xlane.xlu1 %551 }
 0x270   : > { %558 = vst.msk [vmem:[#allocation2] sm:$0xff] %vm557_vm6, %v553_v24  ;;  %v555_v28 = vadd.f32 %v550_v26, %v539_v25 }
 0x271   : > { %v538_v29 = vld [vmem:[#allocation2 + $0x8] sm:$0xff]  ;;  %v540_v30 = vld [vmem:[#allocation2 + $0x18] sm:$0xff] }
 0x272   : > { %v554_v31 = vadd.f32 %v548_v22, %v538_v29  ;;  %560 = vst.msk [vmem:[#allocation2 + $0x10] sm:$0xff] %vm557_vm6, %v555_v28  ;;  %v556_v32 = vadd.f32 %v552_v27, %v540_v30 }
 0x274   : > { %559 = vst.msk [vmem:[#allocation2 + $0x8] sm:$0xff] %vm557_vm6, %v554_v31  ;;  %561 = vst.msk [vmem:[#allocation2 + $0x18] sm:$0xff] %vm557_vm6, %v556_v32 }
 0x275 PF: > { %p1355_p6 = scmp.ne.s32.totalorder %s1623_s18, 1 }
 0x276   : > { %1434 = vmatprep.mubr.msk.f32.mxu0 (!%p1355_p6), %vm411_vm4, %v1708_v1  ;;  %1437 = vmatprep.mubr.msk.f32.mxu1 (!%p1355_p6), %vm411_vm4, %v1718_v3  ;;  %v1636_v40 = vmov (!%p1355_p6), 0   ;;  %s1637_s14 = smov (!%p1355_p6), 1   ;;  %v1638_v46 = vmov (!%p1355_p6), 2   ;;  %v1639_v47 = vmov (!%p1355_p6), 1   ;;  %v1640_v50 = vmov (!%p1355_p6), 3  }
 0x277   : > { %565 = sbr.rel (%p1355_p6) target bundleno = 1292 (0x50c), region = 52  ;;  %v1825_v33 = vld [vmem:[#allocation2] sm:$0xff] (!%p1355_p6)  ;;  %1553 = vset.pattern.permute.xlu1 (!%p1355_p6), %v1636_v40  ;;  %1552 = vset.pattern.permute.xlu0 (!%p1355_p6), %v1636_v40  ;;  %v1641_v12 = vmov (!%p1355_p6), 4   ;;  %vm827_vm7 = vcmask (!%p1355_p6), 23568   ;;  %vm852_vm8 = vcmask (!%p1355_p6), 31768  }
 0x278   : > { %v570_v36 = vmul.f32 (!%p1355_p6), 0.125, %v1825_v33 }
 0x279   : > { %v1827_v34 = vld [vmem:[#allocation2 + $0x10] sm:$0xff] (!%p1355_p6) }
 0x27a   : > { %v572_v37 = vmul.f32 (!%p1355_p6), 0.125, %v1827_v34  ;;  %v574_v42 = vmul.f32 (!%p1355_p6), %v570_v36, %v570_v36 }
 0x27b   : > { %v1829_v35 = vld [vmem:[#allocation2 + $0x8] sm:$0xff] (!%p1355_p6)  ;;  %v1838_v39 = vld [vmem:[#allocation2 + $0x18] sm:$0xff] (!%p1355_p6) }
 0x27c   : > { %v571_v38 = vmul.f32 (!%p1355_p6), 0.125, %v1829_v35  ;;  %v573_v41 = vmul.f32 (!%p1355_p6), 0.125, %v1838_v39  ;;  %v576_v43 = vmul.f32 (!%p1355_p6), %v572_v37, %v572_v37  ;;  %582 = vrot.lane.b32.xlu0 (!%p1355_p6), %v574_v42, %s1637_s14 }
 0x27e   : > { %586 = vrot.lane.b32.xlu1 %v576_v43, %s1637_s14  ;;  %v575_v44 = vmul.f32 %v571_v38, %v571_v38  ;;  %v577_v45 = vmul.f32 %v573_v41, %v573_v41 }
 0x280   : > { %584 = vrot.lane.b32.xlu0 %v575_v44, %s1637_s14 }
 0x282   : > { %588 = vrot.lane.b32.xlu1 %v577_v45, %s1637_s14 }
 0x284   : > { %600 = vperm.xlu0 %1552, %v570_v36  }
 0x286   : > { %605 = vperm.xlu1 %1553, %v571_v38  }
 0x288   : > { %1554 = vset.pattern.permute.xlu0 %v1638_v46 }
 0x289   : > { %655 = vperm.xlu0 %1554, %v1754_v14  }
 0x28a   : > { %610 = vperm.xlu1 %1553, %v572_v37  }
 0x28d   : > { %663 = vperm.xlu0 %1554, %v1762_v15  }
 0x28e   : > { %615 = vperm.xlu1 %1553, %v573_v41  }
 0x291   : > { %1559 = vset.pattern.permute.xlu0 %v1639_v47 }
 0x292   : > { %1555 = vset.pattern.permute.xlu1 %v1638_v46 }
 0x293   : > { %659 = vperm.xlu1 %1555, %v1769_v16  }
 0x297   : > { %1556 = vset.pattern.permute.xlu1 %v1640_v50 }
 0x298   : > { %675 = vperm.xlu1 %1556, %v1754_v14  }
 0x29c   : > { %679 = vperm.xlu1 %1556, %v1769_v16  }
 0x2a0   : > { %1557 = vset.pattern.permute.xlu1 %v1638_v46 }
 0x2a1   : > { %667 = vperm.xlu1 %1557, %v1778_v18  }
 0x2a5   : > { %1558 = vset.pattern.permute.xlu1 %v1639_v47 }
 0x2ee   : > { %v583_v51 = vpop.permute.xlu0 %582 }
 0x2ef   : > { %v594_v55 = vsub.f32 %v570_v36, %v583_v51 }
 0x2f0   : > { %v587_v54 = vpop.permute.xlu1 %586 }
 0x2f1   : > { %v596_v56 = vsub.f32 %v572_v37, %v587_v54  ;;  %v622_v57 = vadd.f32 1e-05, %v594_v55 }
 0x2f2   : > { %v585_v59 = vpop.permute.xlu0 %584 }
 0x2f3   : > { %v624_v58 = vadd.f32 1e-05, %v596_v56  ;;  %1564 = vrsqrt.f32 %v622_v57  ;;  %v595_v61 = vsub.f32 %v571_v38, %v585_v59 }
 0x2f4   : > { %v589_v60 = vpop.permute.xlu1 %588 }
 0x2f5   : > { %v597_v62 = vsub.f32 %v573_v41, %v589_v60  ;;  %1566 = vrsqrt.f32 %v624_v58  ;;  %v623_v63 = vadd.f32 1e-05, %v595_v61 }
 0x2f7   : > { %v625_v0 = vadd.f32 1e-05, %v597_v62  ;;  %1568 = vrsqrt.f32 %v623_v63 }
 0x2f9   : > { %1570 = vrsqrt.f32 %v625_v0 }
 0x2fd   : > { %v1565_v4 = vpop.eup %1564 }
 0x2fe   : > { %632 = vperm.xlu1 %1558, %v1565_v4  }
 0x2ff   : > { %v1567_v8 = vpop.eup %1566 }
 0x301   : > { %v1569_v10 = vpop.eup %1568 }
 0x302   : > { %642 = vperm.xlu1 %1558, %v1567_v8   ;;  %637 = vperm.xlu0 %1559, %v1569_v10  }
 0x303   : > { %v1571_v11 = vpop.eup %1570  ;;  %v601_v22 = vpop.permute.xlu0 %600 }
 0x304   : > { %v618_v26 = vsub.f32 %v1807_v52, %v601_v22 }
 0x305   : > { %v606_v13 = vpop.permute.xlu1 %605 }
 0x306   : > { %1560 = vset.pattern.permute.xlu1 %v1640_v50  ;;  %647 = vperm.xlu0 %1559, %v1571_v11   ;;  %v619_v30 = vsub.f32 %v1803_v48, %v606_v13 }
 0x307   : > { %683 = vperm.xlu1 %1560, %v1762_v15  }
 0x308   : > { %v656_v24 = vpop.permute.xlu0 %655 }
 0x309   : > { %v611_v17 = vpop.permute.xlu1 %610 }
 0x30a   : > { %1561 = vset.pattern.permute.xlu0 %v1640_v50  ;;  %v620_v31 = vsub.f32 %v1809_v53, %v611_v17 }
 0x30b   : > { %687 = vperm.xlu0 %1561, %v1778_v18   ;;  %1562 = vset.pattern.permute.xlu1 %v1641_v12 }
 0x30c   : > { %699 = vperm.xlu1 %1562, %v1754_v14   ;;  %v664_v27 = vpop.permute.xlu0 %663 }
 0x30d   : > { %v616_v19 = vpop.permute.xlu1 %615 }
 0x30e   : > { %v621_v41 = vsub.f32 %v1805_v49, %v616_v19 }
 0x30f   : > { %1563 = vset.pattern.permute.xlu0 %v1641_v12 }
 0x310   : > { %707 = vperm.xlu0 %1563, %v1762_v15   ;;  %703 = vperm.xlu1 %1562, %v1769_v16  }
 0x312   : > { %v660_v20 = vpop.permute.xlu1 %659 }
 0x314   : > { %711 = vperm.xlu1 %1562, %v1778_v18  }
 0x317   : > { %v676_v21 = vpop.permute.xlu1 %675 }
 0x31b   : > { %v680_v23 = vpop.permute.xlu1 %679 }
 0x320   : > { %v668_v25 = vpop.permute.xlu1 %667 }
 0x37d   : > { %v633_v28 = vpop.permute.xlu1 %632 }
 0x37e   : > { %v650_v29 = vmul.f32 %v633_v28, %v618_v26 }
 0x380   : > { %v670_v32 = vmul.f32 %v656_v24, %v650_v29 }
 0x381   : > { %v643_v36 = vpop.permute.xlu1 %642  ;;  %v638_v37 = vpop.permute.xlu0 %637 }
 0x382   : > { %v652_v38 = vmul.f32 %v643_v36, %v620_v31  ;;  %v651_v40 = vmul.f32 %v638_v37, %v619_v30  ;;  %v690_v42 = vadd.f32 %v676_v21, %v670_v32 }
 0x384   : > { %v671_v43 = vmul.f32 %v660_v20, %v651_v40  ;;  %v672_v45 = vmul.f32 %v664_v27, %v652_v38  ;;  %v694_v51 = vmax.f32 %v690_v42, 0.0 }
 0x385   : > { %v648_v44 = vpop.permute.xlu0 %647 }
 0x386   : > { %v691_v46 = vadd.f32 %v680_v23, %v671_v43  ;;  %v653_v47 = vmul.f32 %v648_v44, %v621_v41  ;;  %v684_v50 = vpop.permute.xlu1 %683 }
 0x387   : > { %v692_v56 = vadd.f32 %v684_v50, %v672_v45 }
 0x388   : > { %v695_v54 = vmax.f32 %v691_v46, 0.0  ;;  %v673_v55 = vmul.f32 %v668_v25, %v653_v47 }
 0x389   : > { %v696_v60 = vmax.f32 %v692_v56, 0.0 }
 0x38a   : > { %v1473_v57 = vpack.c.bf16 %v695_v54, %v694_v51  ;;  %v688_v58 = vpop.permute.xlu0 %687 }
 0x38b   : > { %v693_v59 = vadd.f32 %v688_v58, %v673_v55  ;;  %v700_v63 = vpop.permute.xlu1 %699 }
 0x38c   : > { %1474 = vmatprep.subr.bf16.mxu0 %v1473_v57  ;;  %1499 = vmatprep.subr.bf16.mxu1 %v1473_v57 }
 0x38d   : > { %v697_v61 = vmax.f32 %v693_v59, 0.0  ;;  %1476 = vmatpush3.bf16.msra.mxu0 %v1473_v57  ;;  %1501 = vmatpush3.bf16.msra.mxu1 %v1473_v57 }
 0x38f   : > { %v1477_v62 = vpack.c.bf16 %v697_v61, %v696_v60  ;;  %v704_v0 = vpop.permute.xlu1 %703  ;;  %v708_v4 = vpop.permute.xlu0 %707 }
 0x391   : > { %1478 = vmatprep.subr.bf16.mxu0 %v1477_v62  ;;  %1500 = vmatprep.subr.bf16.mxu1 %v1477_v62 }
 0x392   : > { %1480 = vmatpush3.bf16.msra.mxu0 %v1477_v62  ;;  %1502 = vmatpush3.bf16.msra.mxu1 %v1477_v62 }
 0x393   : > { %v712_v20 = vpop.permute.xlu1 %711 }
 0x395   : > { %1435 = vmatmul.mubr.msk.f32.vlgmr.msra.gmra.mrb[0].mxu0 %vm411_vm4, %v1713_v2  ;;  %1438 = vmatmul.mubr.msk.f32.vlgmr.msra.gmra.mrb[0].mxu1 %vm411_vm4, %v1723_v5 }
 0x468   : > { %v1436_v8 = vpop.f32.mrb[0].mxu0  ;;  %v1439_v10 = vpop.f32.mrb[0].mxu1 }
 0x469   : > { %v798_v11 = vadd.f32 %v1436_v8, %v704_v0  ;;  %v792_v12 = vpop.f32.mrb[1].mxu0  ;;  %v802_v13 = vpop.f32.mrb[1].mxu1  ;;  %v808_v22 = vadd.f32 %v1439_v10, %v712_v20 }
 0x46a   : > { %v793_v17 = vadd.f32 %v792_v12, %v700_v63  ;;  %v803_v19 = vadd.f32 %v802_v13, %v708_v4 }
 0x46b   : > { %v812_v21 = vsel %vm267_vm3, %v798_v11, 0.0  ;;  %v814_v25 = vsel %vm267_vm3, %v808_v22, 0.0 }
 0x46c   : > { %817 = vadd.xlane.f32.xlu0 %v812_v21  ;;  %v811_v23 = vsel %vm267_vm3, %v793_v17, 0.0  ;;  %v813_v24 = vsel %vm267_vm3, %v803_v19, 0.0  ;;  %v837_v27 = vmul.f32 %v812_v21, %v812_v21  ;;  %v839_v29 = vmul.f32 %v814_v25, %v814_v25 }
 0x46d   : > { %815 = vadd.xlane.f32.xlu1 %v811_v23  ;;  %v836_v26 = vmul.f32 %v811_v23, %v811_v23  ;;  %v838_v28 = vmul.f32 %v813_v24, %v813_v24 }
 0x470   : > { %819 = vadd.xlane.f32.xlu0 %v813_v24 }
 0x471   : > { %821 = vadd.xlane.f32.xlu1 %v814_v25 }
 0x474   : > { %840 = vadd.xlane.f32.xlu0 %v836_v26 }
 0x475   : > { %842 = vadd.xlane.f32.xlu1 %v837_v27 }
 0x478   : > { %844 = vadd.xlane.f32.xlu0 %v838_v28 }
 0x479   : > { %846 = vadd.xlane.f32.xlu1 %v839_v29 }
 0x4f9   : > { %v818_v30 = vpop.xlane.xlu0 %817 }
 0x4fa   : > { %v824_v31 = vadd.f32 %v818_v30, %v1829_v35  ;;  %v816_v32 = vpop.xlane.xlu1 %815 }
 0x4fb   : > { %v823_v36 = vadd.f32 %v816_v32, %v1825_v33 }
 0x4fc   : > { %829 = vst.msk [vmem:[#allocation2 + $0x8] sm:$0xff] %vm827_vm7, %v824_v31 }
 0x4fd   : > { %828 = vst.msk [vmem:[#allocation2] sm:$0xff] %vm827_vm7, %v823_v36  ;;  %v820_v9 = vpop.xlane.xlu0 %819 }
 0x4fe   : > { %v825_v37 = vadd.f32 %v820_v9, %v1827_v34  ;;  %v822_v38 = vpop.xlane.xlu1 %821 }
 0x4ff   : > { %v826_v40 = vadd.f32 %v822_v38, %v1838_v39 }
 0x500   : > { %830 = vst.msk [vmem:[#allocation2 + $0x10] sm:$0xff] %vm827_vm7, %v825_v37 }
 0x501   : > { %831 = vst.msk [vmem:[#allocation2 + $0x18] sm:$0xff] %vm827_vm7, %v826_v40  ;;  %v841_v41 = vpop.xlane.xlu0 %840 }
 0x502   : > { %v843_v42 = vpop.xlane.xlu1 %842 }
 0x503   : > { %v833_v43 = vld [vmem:[#allocation2 + $0x8] sm:$0xff] }
 0x504   : > { %v832_v44 = vld [vmem:[#allocation2] sm:$0xff]  ;;  %v849_v45 = vadd.f32 %v843_v42, %v833_v43 }
 0x505   : > { %v848_v35 = vadd.f32 %v841_v41, %v832_v44  ;;  %v845_v46 = vpop.xlane.xlu0 %844 }
 0x506   : > { %854 = vst.msk [vmem:[#allocation2 + $0x8] sm:$0xff] %vm852_vm8, %v849_v45  ;;  %v847_v51 = vpop.xlane.xlu1 %846 }
 0x507   : > { %853 = vst.msk [vmem:[#allocation2] sm:$0xff] %vm852_vm8, %v848_v35  ;;  %v834_v33 = vld [vmem:[#allocation2 + $0x10] sm:$0xff] }
 0x508   : > { %v850_v47 = vadd.f32 %v845_v46, %v834_v33  ;;  %v835_v50 = vld [vmem:[#allocation2 + $0x18] sm:$0xff] }
 0x509   : > { %v851_v34 = vadd.f32 %v847_v51, %v835_v50 }
 0x50a   : > { %855 = vst.msk [vmem:[#allocation2 + $0x10] sm:$0xff] %vm852_vm8, %v850_v47 }
 0x50b   : > { %856 = vst.msk [vmem:[#allocation2 + $0x18] sm:$0xff] %vm852_vm8, %v851_v34 }
 0x50c PF: > { %p1360_p7 = scmp.ne.s32.totalorder %s1623_s18, 2 }
 0x50d   : > { %v862_v55 = vld [vmem:[#allocation2 + $0x8] sm:$0xff] (!%p1360_p7)  ;;  %1448 = vmatprep.mubr.msk.f32.mxu0 (!%p1360_p7), %vm411_vm4, %v1708_v1  ;;  %v1642_v60 = vmov (!%p1360_p7), 0   ;;  %s1643_s18 = smov (!%p1360_p7), 1   ;;  %v1644_v4 = vmov (!%p1360_p7), 2   ;;  %v1645_v8 = vmov (!%p1360_p7), 1   ;;  %v1646_v10 = vmov (!%p1360_p7), 3  }
 0x50e   : > { %860 = sbr.rel (%p1360_p7) target bundleno = 2057 (0x809), region = 56  ;;  %v861_v39 = vld [vmem:[#allocation2] sm:$0xff] (!%p1360_p7)  ;;  %v1880_v58 = vmul.f32 (!%p1360_p7), 0.125, %v862_v55  ;;  %1573 = vset.pattern.permute.xlu1 (!%p1360_p7), %v1642_v60  ;;  %1572 = vset.pattern.permute.xlu0 (!%p1360_p7), %v1642_v60  ;;  %v1647_v31 = vmov (!%p1360_p7), 4   ;;  %v1648_v32 = vmov (!%p1360_p7), 6   ;;  %v1649_v36 = vmov (!%p1360_p7), 5  }
 0x50f   : > { %v1876_v56 = vmul.f32 (!%p1360_p7), 0.125, %v861_v39  ;;  %vm1651_vm9 = vmmov (!%p1360_p7), 0  }
 0x510   : > { %v870_v1 = vmul.f32 (!%p1360_p7), %v1880_v58, %v1880_v58 }
 0x511   : > { %v863_v54 = vld [vmem:[#allocation2 + $0x10] sm:$0xff] (!%p1360_p7)  ;;  %v869_v62 = vmul.f32 (!%p1360_p7), %v1876_v56, %v1876_v56 }
 0x512   : > { %v1878_v57 = vmul.f32 (!%p1360_p7), 0.125, %v863_v54  ;;  %v864_v59 = vld [vmem:[#allocation2 + $0x18] sm:$0xff] (!%p1360_p7) }
 0x513   : > { %v1882_v61 = vmul.f32 (!%p1360_p7), 0.125, %v864_v59  ;;  %877 = vrot.lane.b32.xlu0 (!%p1360_p7), %v869_v62, %s1643_s18 }
 0x514   : > { %v871_v63 = vmul.f32 (!%p1360_p7), %v1878_v57, %v1878_v57 }
 0x515   : > { %v872_v0 = vmul.f32 %v1882_v61, %v1882_v61 }
 0x516   : > { %881 = vrot.lane.b32.xlu1 %v871_v63, %s1643_s18 }
 0x517   : > { %879 = vrot.lane.b32.xlu0 %v870_v1, %s1643_s18 }
 0x51a   : > { %883 = vrot.lane.b32.xlu1 %v872_v0, %s1643_s18 }
 0x51b   : > { %895 = vperm.xlu0 %1572, %v1876_v56  }
 0x51e   : > { %900 = vperm.xlu1 %1573, %v1880_v58  }
 0x51f   : > { %1574 = vset.pattern.permute.xlu0 %v1644_v4 }
 0x520   : > { %950 = vperm.xlu0 %1574, %v1754_v14  }
 0x522   : > { %905 = vperm.xlu1 %1573, %v1878_v57  }
 0x524   : > { %958 = vperm.xlu0 %1574, %v1762_v15  }
 0x526   : > { %910 = vperm.xlu1 %1573, %v1882_v61  }
 0x528   : > { %1579 = vset.pattern.permute.xlu0 %v1645_v8 }
 0x52a   : > { %1575 = vset.pattern.permute.xlu1 %v1644_v4 }
 0x52b   : > { %954 = vperm.xlu1 %1575, %v1769_v16  }
 0x52f   : > { %1576 = vset.pattern.permute.xlu1 %v1646_v10 }
 0x530   : > { %970 = vperm.xlu1 %1576, %v1754_v14  }
 0x534   : > { %974 = vperm.xlu1 %1576, %v1769_v16  }
 0x538   : > { %1577 = vset.pattern.permute.xlu1 %v1644_v4 }
 0x539   : > { %962 = vperm.xlu1 %1577, %v1778_v18  }
 0x53d   : > { %1578 = vset.pattern.permute.xlu1 %v1645_v8 }
 0x585   : > { %v878_v11 = vpop.permute.xlu0 %877 }
 0x586   : > { %v889_v13 = vsub.f32 %v1876_v56, %v878_v11  ;;  %v1653_v11 = vmov 7  }
 0x588   : > { %v882_v12 = vpop.permute.xlu1 %881  ;;  %v917_v19 = vadd.f32 1e-05, %v889_v13 }
 0x589   : > { %v891_v17 = vsub.f32 %v1878_v57, %v882_v12  ;;  %v880_v21 = vpop.permute.xlu0 %879 }
 0x58a   : > { %1597 = vrsqrt.f32 %v917_v19  ;;  %v890_v23 = vsub.f32 %v1880_v58, %v880_v21 }
 0x58b   : > { %v919_v20 = vadd.f32 1e-05, %v891_v17 }
 0x58c   : > { %v884_v22 = vpop.permute.xlu1 %883  ;;  %v918_v25 = vadd.f32 1e-05, %v890_v23 }
 0x58d   : > { %v892_v24 = vsub.f32 %v1882_v61, %v884_v22  ;;  %1599 = vrsqrt.f32 %v919_v20 }
 0x58e   : > { %1601 = vrsqrt.f32 %v918_v25 }
 0x58f   : > { %v920_v26 = vadd.f32 1e-05, %v892_v24 }
 0x591   : > { %1603 = vrsqrt.f32 %v920_v26 }
 0x594   : > { %v1598_v27 = vpop.eup %1597 }
 0x595   : > { %927 = vperm.xlu1 %1578, %v1598_v27  }
 0x597   : > { %v1600_v28 = vpop.eup %1599 }
 0x598   : > { %v1602_v29 = vpop.eup %1601 }
 0x599   : > { %937 = vperm.xlu1 %1578, %v1600_v28   ;;  %932 = vperm.xlu0 %1579, %v1602_v29  }
 0x59a   : > { %v896_v40 = vpop.permute.xlu0 %895 }
 0x59b   : > { %v1604_v30 = vpop.eup %1603 }
 0x59d   : > { %1580 = vset.pattern.permute.xlu1 %v1646_v10  ;;  %942 = vperm.xlu0 %1579, %v1604_v30  }
 0x59e   : > { %978 = vperm.xlu1 %1580, %v1762_v15  }
 0x59f   : > { %v951_v42 = vpop.permute.xlu0 %950 }
 0x5a1   : > { %1581 = vset.pattern.permute.xlu0 %v1646_v10 }
 0x5a2   : > { %1582 = vset.pattern.permute.xlu1 %v1647_v31  ;;  %982 = vperm.xlu0 %1581, %v1778_v18  }
 0x5a3   : > { %994 = vperm.xlu1 %1582, %v1754_v14   ;;  %v959_v44 = vpop.permute.xlu0 %958 }
 0x5a6   : > { %1585 = vset.pattern.permute.xlu0 %v1647_v31 }
 0x5a7   : > { %998 = vperm.xlu1 %1582, %v1769_v16   ;;  %1006 = vperm.xlu0 %1585, %v1778_v18  }
 0x5ab   : > { %1583 = vset.pattern.permute.xlu1 %v1644_v4  ;;  %1586 = vset.pattern.permute.xlu0 %v1644_v4 }
 0x5ac   : > { %1111 = vperm.xlu1 %1583, %v1880_v58   ;;  %1107 = vperm.xlu0 %1586, %v1876_v56  }
 0x5b0   : > { %1584 = vset.pattern.permute.xlu1 %v1647_v31  ;;  %1115 = vperm.xlu0 %1586, %v1878_v57  }
 0x5b1   : > { %1002 = vperm.xlu1 %1584, %v1762_v15  }
 0x5b4   : > { %1589 = vset.pattern.permute.xlu0 %v1648_v32 }
 0x5b5   : > { %1587 = vset.pattern.permute.xlu1 %v1644_v4  ;;  %1167 = vperm.xlu0 %1589, %v1754_v14  }
 0x5b6   : > { %1119 = vperm.xlu1 %1587, %v1882_v61  }
 0x5b9   : > { %1590 = vset.pattern.permute.xlu0 %v1649_v36 }
 0x5ba   : > { %1588 = vset.pattern.permute.xlu1 %v1649_v36  ;;  %1151 = vperm.xlu0 %1590, %v1769_v16  }
 0x5bb   : > { %1147 = vperm.xlu1 %1588, %v1754_v14   ;;  %v901_v14 = vpop.permute.xlu1 %900 }
 0x5bc   : > { %v914_v33 = vsub.f32 %v1803_v48, %v901_v14 }
 0x5be   : > { %1159 = vperm.xlu0 %1590, %v1778_v18  }
 0x5bf   : > { %1591 = vset.pattern.permute.xlu1 %v1648_v32  ;;  %v906_v9 = vpop.permute.xlu1 %905 }
 0x5c0   : > { %1171 = vperm.xlu1 %1591, %v1769_v16   ;;  %v915_v46 = vsub.f32 %v1809_v53, %v906_v9 }
 0x5c2   : > { %1596 = vset.pattern.permute.xlu0 %v1653_v11 }
 0x5c3   : > { %v911_v37 = vpop.permute.xlu1 %910  ;;  %1192 = vperm.xlu0 %1596, %v1733_v7  }
 0x5c4   : > { %1592 = vset.pattern.permute.xlu1 %v1649_v36  ;;  %v916_v39 = vsub.f32 %v1805_v49, %v911_v37  ;;  %v1650_v49 = vmov 0.0|0.0  }
 0x5c5   : > { %1155 = vperm.xlu1 %1592, %v1762_v15   ;;  %1489 = vmatprep.subr.bf16.mxu1 %v1650_v49 }
 0x5c7   : > { %v955_v38 = vpop.permute.xlu1 %954 }
 0x5c9   : > { %1593 = vset.pattern.permute.xlu1 %v1648_v32 }
 0x5ca   : > { %1175 = vperm.xlu1 %1593, %v1762_v15   ;;  %v913_v15 = vsub.f32 %v1807_v52, %v896_v40 }
 0x5cb   : > { %v971_v16 = vpop.permute.xlu1 %970 }
 0x5ce   : > { %1594 = vset.pattern.permute.xlu1 %v1646_v10  ;;  %v1652_v10 = vmov 0.0  }
 0x5cf   : > { %1127 = vperm.xlu1 %1594, %v1598_v27   ;;  %v975_v41 = vpop.permute.xlu1 %974  ;;  %1462 = vmatprep.mubr.msk.f32.mxu1 %vm1651_vm9, %v1652_v10 }
 0x5d3   : > { %1131 = vperm.xlu1 %1594, %v1602_v29   ;;  %v963_v43 = vpop.permute.xlu1 %962 }
 0x5d7   : > { %1135 = vperm.xlu1 %1594, %v1600_v28  }
 0x5db   : > { %1139 = vperm.xlu1 %1594, %v1604_v30  }
 0x5df   : > { %1595 = vset.pattern.permute.xlu1 %v1648_v32 }
 0x5e0   : > { %1179 = vperm.xlu1 %1595, %v1778_v18  }
 0x614   : > { %v928_v45 = vpop.permute.xlu1 %927 }
 0x615   : > { %v945_v35 = vmul.f32 %v928_v45, %v913_v15 }
 0x617   : > { %v965_v47 = vmul.f32 %v951_v42, %v945_v35 }
 0x618   : > { %v938_v18 = vpop.permute.xlu1 %937  ;;  %v933_v50 = vpop.permute.xlu0 %932 }
 0x619   : > { %v947_v51 = vmul.f32 %v938_v18, %v915_v46  ;;  %v946_v34 = vmul.f32 %v933_v50, %v914_v33  ;;  %v985_v55 = vadd.f32 %v971_v16, %v965_v47 }
 0x61b   : > { %v966_v54 = vmul.f32 %v955_v38, %v946_v34  ;;  %v967_v57 = vmul.f32 %v959_v44, %v947_v51  ;;  %v989_v61 = vmax.f32 %v985_v55, 0.0 }
 0x61c   : > { %v943_v56 = vpop.permute.xlu0 %942 }
 0x61d   : > { %v948_v58 = vmul.f32 %v943_v56, %v916_v39  ;;  %v979_v52 = vpop.permute.xlu1 %978  ;;  %v986_v59 = vadd.f32 %v975_v41, %v966_v54 }
 0x61e   : > { %v987_v48 = vadd.f32 %v979_v52, %v967_v57 }
 0x61f   : > { %v968_v60 = vmul.f32 %v963_v43, %v948_v58  ;;  %v990_v62 = vmax.f32 %v986_v59, 0.0 }
 0x620   : > { %v991_v0 = vmax.f32 %v987_v48, 0.0 }
 0x621   : > { %v983_v63 = vpop.permute.xlu0 %982  ;;  %v1481_v53 = vpack.c.bf16 %v990_v62, %v989_v61 }
 0x622   : > { %v988_v1 = vadd.f32 %v983_v63, %v968_v60  ;;  %v995_v12 = vpop.permute.xlu1 %994 }
 0x623   : > { %1482 = vmatprep.subr.bf16.mxu0 %v1481_v53 }
 0x624   : > { %v992_v4 = vmax.f32 %v988_v1, 0.0  ;;  %1484 = vmatpush3.bf16.msra.mxu0 %v1481_v53 }
 0x626   : > { %v1485_v8 = vpack.c.bf16 %v992_v4, %v991_v0  ;;  %v999_v13 = vpop.permute.xlu1 %998  ;;  %v1007_v23 = vpop.permute.xlu0 %1006 }
 0x628   : > { %1486 = vmatprep.subr.bf16.mxu0 %v1485_v8 }
 0x629   : > { %1488 = vmatpush3.bf16.msra.mxu0 %v1485_v8 }
 0x62b   : > { %v1112_v17 = vpop.permute.xlu1 %1111  ;;  %v1108_v24 = vpop.permute.xlu0 %1107 }
 0x62c   : > { %1449 = vmatmul.mubr.msk.f32.vlgmr.msra.gmra.mrb[0].mxu0 %vm411_vm4, %v1713_v2 }
 0x62d   : > { %1451 = vmatprep.mubr.msk.f32.mxu0 %vm411_vm4, %v1718_v3 }
 0x62f   : > { %v1116_v26 = vpop.permute.xlu0 %1115 }
 0x630   : > { %1452 = vmatmul.mubr.msk.f32.gmra.mrb[2].mxu0 %vm411_vm4, %v1723_v5  ;;  %v1003_v19 = vpop.permute.xlu1 %1002 }
 0x634   : > { %v1168_v27 = vpop.permute.xlu0 %1167 }
 0x635   : > { %v1120_v2 = vpop.permute.xlu1 %1119 }
 0x639   : > { %v1152_v14 = vpop.permute.xlu0 %1151 }
 0x63a   : > { %v1148_v20 = vpop.permute.xlu1 %1147 }
 0x63d   : > { %v1160_v47 = vpop.permute.xlu0 %1159 }
 0x63f   : > { %v1172_v21 = vpop.permute.xlu1 %1171 }
 0x642   : > { %v1193_v60 = vpop.permute.xlu0 %1192 }
 0x644   : > { %v1156_v3 = vpop.permute.xlu1 %1155 }
 0x649   : > { %v1176_v22 = vpop.permute.xlu1 %1175 }
 0x64e   : > { %v1128_v5 = vpop.permute.xlu1 %1127 }
 0x652   : > { %v1132_v25 = vpop.permute.xlu1 %1131 }
 0x656   : > { %v1136_v28 = vpop.permute.xlu1 %1135 }
 0x65a   : > { %v1140_v40 = vpop.permute.xlu1 %1139 }
 0x65f   : > { %v1180_v18 = vpop.permute.xlu1 %1179 }
 0x6ff   : > { %v1450_v29 = vpop.f32.mrb[0].mxu0 }
 0x700   : > { %v1093_v30 = vadd.f32 %v1450_v29, %v999_v13  ;;  %v1087_v31 = vpop.f32.mrb[1].mxu0 }
 0x701   : > { %v1088_v7 = vadd.f32 %v1087_v31, %v995_v12 }
 0x702   : > { %v1123_v32 = vsub.f32 %v1093_v30, %v1112_v17 }
 0x703   : > { %v1122_v36 = vsub.f32 %v1088_v7, %v1108_v24  ;;  %v1453_v9 = vpop.f32.mrb[2].mxu0 }
 0x704   : > { %v1143_v37 = vmul.f32 %v1132_v25, %v1123_v32  ;;  %v1103_v38 = vadd.f32 %v1453_v9, %v1007_v23  ;;  %v1097_v16 = vpop.f32.mrb[3].mxu0 }
 0x705   : > { %v1142_v41 = vmul.f32 %v1128_v5, %v1122_v36  ;;  %v1098_v42 = vadd.f32 %v1097_v16, %v1003_v19 }
 0x706   : > { %v1163_v43 = vmul.f32 %v1152_v14, %v1143_v37  ;;  %v1125_v15 = vsub.f32 %v1103_v38, %v1120_v2 }
 0x707   : > { %v1124_v44 = vsub.f32 %v1098_v42, %v1116_v26  ;;  %v1162_v45 = vmul.f32 %v1148_v20, %v1142_v41 }
 0x708   : > { %v1183_v35 = vadd.f32 %v1172_v21, %v1163_v43  ;;  %v1145_v33 = vmul.f32 %v1140_v40, %v1125_v15 }
 0x709   : > { %v1144_v46 = vmul.f32 %v1136_v28, %v1124_v44  ;;  %v1182_v50 = vadd.f32 %v1168_v27, %v1162_v45 }
 0x70a   : > { %v1187_v51 = vmax.f32 %v1183_v35, 0.0  ;;  %v1165_v34 = vmul.f32 %v1160_v47, %v1145_v33 }
 0x70b   : > { %v1164_v39 = vmul.f32 %v1156_v3, %v1144_v46  ;;  %v1186_v54 = vmax.f32 %v1182_v50, 0.0 }
 0x70c   : > { %v1185_v55 = vadd.f32 %v1180_v18, %v1165_v34 }
 0x70d   : > { %v1184_v56 = vadd.f32 %v1176_v22, %v1164_v39  ;;  %v1490_v57 = vpack.c.bf16 %v1187_v51, %v1186_v54 }
 0x70e   : > { %v1189_v58 = vmax.f32 %v1185_v55, 0.0 }
 0x70f   : > { %v1188_v52 = vmax.f32 %v1184_v56, 0.0  ;;  %1491 = vmatpush3.bf16.msra.mxu1 %v1490_v57 }
 0x710   : > { %1492 = vmatprep.subr.bf16.mxu1 %v1650_v49 }
 0x711   : > { %v1493_v59 = vpack.c.bf16 %v1189_v58, %v1188_v52 }
 0x713   : > { %1494 = vmatpush3.bf16.msra.mxu1 %v1493_v59 }
 0x716   : > { %1463 = vmatmul.mubr.msk.f32.vlgmr.msra.gmra.mrb[0].mxu1 %vm411_vm4, %v1728_v6 }
 0x7e9   : > { %v1264_v61 = vpop.f32.mrb[0].mxu1 }
 0x7ea   : > { %v1265_v62 = vadd.f32 %v1264_v61, %v1193_v60  ;;  %v1464_v48 = vpop.f32.mrb[1].mxu1 }
 0x7ec   : > { %v1268_v63 = vsub.f32 0.0, %v1265_v62 }
 0x7ee   : > { %v1269_v53 = vmul.f32 1.442695, %v1268_v63 }
 0x7f0   : > { %1605 = vpow2.f32 %v1269_v53 }
 0x7fa   : > { %v1606_v1 = vpop.eup %1605 }
 0x7fb   : > { %v1271_v0 = vadd.f32 1.0, %v1606_v1 }
 0x7fd   : > { %1607 = vrcp.f32 %v1271_v0 }
 0x807   : > { %v1608_v4 = vpop.eup %1607 }
 0x808   : > { %1273 = vst [vmem:[%s1958_s5] sm:$0xf] %v1608_v4 }
 0x809 PF: > { %s15_s20 = sadd.s32 1, %s1631_s20   ;;  %s1959_s18 = smov %s1627_s19 }
 0x80a   : > { %p12_p8 = scmp.ge.s32.totalorder %s15_s20, 5   ;;  %s1960_s19 = smov %s1962_s21 }
 0x80c   :  { %14 = sbr.rel (!%p12_p8) target bundleno = 2 (0x2), region = 87 }

</bundles_post_ra>
